<compile_context>
chip_gen: v7x
topology: tpu7x:2x2x1
jax: 0.10.0
libtpu: 0.0.40
codegen_flags: <defaults>
</compile_context>

<pallas_src>
import numpy as np
import jax
import jax.numpy as jnp
from jax.experimental import pallas as pl
from jax.experimental.pallas import tpu as pltpu


# ---------------------------------------------------------------------------
# Parameter init (deterministic port of default_init / variance_scaling)
# ---------------------------------------------------------------------------
def default_init_uniform(key, shape, scale=1.0, in_axis=1, out_axis=0,
                         dtype=jnp.float32):
    """variance_scaling(scale, 'fan_avg', 'uniform') — matches the PyTorch code."""
    scale = 1e-10 if scale == 0 else scale
    receptive_field_size = np.prod(shape) / shape[in_axis] / shape[out_axis]
    fan_in = shape[in_axis] * receptive_field_size
    fan_out = shape[out_axis] * receptive_field_size
    denominator = (fan_in + fan_out) / 2.0
    variance = scale / denominator
    bound = np.sqrt(3.0 * variance)
    return jax.random.uniform(key, shape, dtype=dtype, minval=-bound, maxval=bound)


# ---------------------------------------------------------------------------
# Pallas kernel: pure streaming FMA  out = x * w + bias
# ---------------------------------------------------------------------------
def _fma_kernel(x_ref, bias_ref, w_ref, o_ref):
    """One (batch b, spatial-row tile s) block.

    x_ref   : (1, TILE_R, CF)  lane-dense x tile
    bias_ref: (1, 1, CF)       per-batch conditioning bias (already * weight)
    w_ref   : (1, CF)          channel weight tiled to the folded lane dim
    o_ref   : (1, TILE_R, CF)  output tile
    """
    o_ref[...] = (x_ref[...] * w_ref[...] + bias_ref[...]).astype(o_ref.dtype)


# ---------------------------------------------------------------------------
# Layout helpers
# ---------------------------------------------------------------------------
def _fold_factor(S, C):
    """Smallest F with (F*C) % 128 == 0 and S % F == 0; else 1 (block == full C dim)."""
    if C % 128 == 0:
        return 1
    F = 128 // int(np.gcd(C, 128))
    return F if S % F == 0 else 1


def _choose_tile_rows(s_rows, row_bytes, target_bytes):
    """Largest row-tile that divides s_rows, is 8-aligned (or full extent), fits target."""
    if s_rows * row_bytes <= target_bytes:
        return s_rows
    max_rows = max(8, int(target_bytes // row_bytes))
    best = None
    for t in range(8, min(s_rows, max_rows) + 1, 8):
        if s_rows % t == 0:
            best = t
    return best if best is not None else s_rows


# ---------------------------------------------------------------------------
# Wrapper
# ---------------------------------------------------------------------------
def contract_dense_separable(x, temb, dense_w, dense_b, weight, *,
                             target_block_bytes=4 << 20):
    """x: (B, S, C), temb: (B, T) or None, dense_w: (C, T), dense_b: (C,), weight: (C,)."""
    B, S, C = x.shape
    assert dense_b.shape == (C,) and weight.shape == (C,)

    # --- hoisted time-embedding branch (tiny O(B*T*C); runs once in XLA) ---------
    if temb is not None:
        T = temb.shape[1]
        assert dense_w.shape == (C, T)
        emb = jax.nn.silu(temb) @ dense_w.T + dense_b          # Dense_0(act(temb))  (B, C)
        bias = (emb * weight).astype(x.dtype)                  # fold *weight into the bias
    else:
        bias = jnp.zeros((B, C), dtype=x.dtype)

    # --- fold channels into the lane dim so the trailing dim is 128-aligned ------
    F = _fold_factor(S, C)
    CF = F * C
    S_rows = S // F
    xf = x.reshape(B, S_rows, CF)
    w_f = jnp.tile(weight.astype(x.dtype), F).reshape(1, CF)   # (1, CF)
    bias_f = jnp.tile(bias, (1, F)).reshape(B, 1, CF)          # (B, 1, CF)

    # --- big spatial tiles (amortize per-step overhead; VMEM-safe on all chips) --
    itemsize = x.dtype.itemsize
    tile_rows = _choose_tile_rows(S_rows, CF * itemsize, target_block_bytes)

    block_bytes = tile_rows * CF * itemsize
    vmem_needed = 4 * block_bytes + (2 << 20)   # double-buffered in+out tiles + headroom
    vmem_limit = int(min(max(vmem_needed, 32 << 20), 100 << 20))

    grid = (B, S_rows // tile_rows)
    out = pl.pallas_call(
        _fma_kernel,
        out_shape=jax.ShapeDtypeStruct((B, S_rows, CF), x.dtype),
        grid_spec=pltpu.PrefetchScalarGridSpec(
            num_scalar_prefetch=0,
            grid=grid,
            in_specs=[
                pl.BlockSpec((1, tile_rows, CF), lambda b, s: (b, s, 0)),  # x tile
                pl.BlockSpec((1, 1, CF), lambda b, s: (b, 0, 0)),          # per-batch bias
                pl.BlockSpec((1, CF), lambda b, s: (0, 0)),                # tiled weight
            ],
            out_specs=pl.BlockSpec((1, tile_rows, CF), lambda b, s: (b, s, 0)),
        ),
        compiler_params=pltpu.CompilerParams(
            dimension_semantics=("parallel", "parallel"),
            vmem_limit_bytes=vmem_limit),
    )(xf, bias_f, w_f)
    return out.reshape(B, S, C)


# ---------------------------------------------------------------------------
# Pure-JAX reference (mirrors the PyTorch forward exactly)
# ---------------------------------------------------------------------------
def reference(x, temb, dense_w, dense_b, weight):
    emb = jax.nn.silu(temb) @ dense_w.T + dense_b       # Dense_0(act(temb))
    x = x + emb[:, None, :]                             # x += ...[:, None]
    return x * weight                                   # h = x * self.weight


if __name__ == "__main__":
    key = jax.random.PRNGKey(0)
    k_x, k_t, k_w, k_dw, k_x2, k_w2 = jax.random.split(key, 6)

    # --- primary test: B=2, spatial 16x16 flattened, C=32 (lane-folding path, F=4) ---
    B, S, C = 2, 256, 32
    T = C                                     # temb_dim = weight.shape[0], hidden = C
    x = jax.random.normal(k_x, (B, S, C), dtype=jnp.float32)
    temb = jax.random.normal(k_t, (B, T), dtype=jnp.float32)
    weight = jax.random.normal(k_w, (C,), dtype=jnp.float32) * 0.1
    dense_w = default_init_uniform(k_dw, (C, T))          # (out=hidden, in=T)
    dense_b = jnp.zeros((C,), dtype=jnp.float32)

    out = jax.block_until_ready(
        contract_dense_separable(x, temb, dense_w, dense_b, weight))
    ref = reference(x, temb, dense_w, dense_b, weight)
    np.testing.assert_allclose(np.asarray(out), np.asarray(ref),
                               rtol=1e-5, atol=1e-5)

    # --- secondary test: C already lane-dense (F=1 path) ---
    B2, S2, C2 = 2, 64, 128
    x2 = jax.random.normal(k_x2, (B2, S2, C2), dtype=jnp.float32)
    temb2 = jax.random.normal(k_t, (B2, C2), dtype=jnp.float32)
    weight2 = jax.random.normal(k_w2, (C2,), dtype=jnp.float32) * 0.1
    dense_w2 = default_init_uniform(k_dw, (C2, C2))
    dense_b2 = jnp.zeros((C2,), dtype=jnp.float32)
    out2 = jax.block_until_ready(
        contract_dense_separable(x2, temb2, dense_w2, dense_b2, weight2))
    ref2 = reference(x2, temb2, dense_w2, dense_b2, weight2)
    np.testing.assert_allclose(np.asarray(out2), np.asarray(ref2),
                               rtol=1e-5, atol=1e-5)

    print("KERNEL_OK")
</pallas_src>

<mosaic_0001>
module attributes {stable_mosaic.version = 11 : i64} {
  func.func @_fma_kernel(%arg0: i32, %arg1: i32, %arg2: memref<1x64x128xf32, #tpu.memory_space<vmem>>, %arg3: memref<1x1x128xf32, #tpu.memory_space<vmem>>, %arg4: memref<1x128xf32, #tpu.memory_space<vmem>>, %arg5: memref<1x64x128xf32, #tpu.memory_space<vmem>>) attributes {dimension_semantics = [#tpu.dimension_semantics<parallel>, #tpu.dimension_semantics<parallel>], iteration_bounds = array<i64: 2, 1>, scalar_prefetch = 0 : i64, scratch_operands = 0 : i64, tpu.core_type = #tpu.core_type<tc>, window_params = [{transform_indices = @transform_0, window_bounds = array<i64: 1, 64, 128>}, {transform_indices = @transform_1, window_bounds = array<i64: 1, 1, 128>}, {pipeline_mode = #tpu.pipeline_mode<synchronous>, transform_indices = @transform_2, window_bounds = array<i64: 1, 128>}, {transform_indices = @transform_3, window_bounds = array<i64: 1, 64, 128>}]} {
    %c0 = arith.constant 0 : index
    %c0_0 = arith.constant 0 : index
    %c0_1 = arith.constant 0 : index
    %0 = vector.load %arg2[%c0, %c0_0, %c0_1] : memref<1x64x128xf32, #tpu.memory_space<vmem>>, vector<1x64x128xf32>
    %c0_2 = arith.constant 0 : index
    %c0_3 = arith.constant 0 : index
    %1 = vector.load %arg4[%c0_2, %c0_3] : memref<1x128xf32, #tpu.memory_space<vmem>>, vector<1x128xf32>
    %2 = vector.shape_cast %1 : vector<1x128xf32> to vector<1x1x128xf32>
    %3 = vector.broadcast %2 : vector<1x1x128xf32> to vector<1x64x128xf32>
    %4 = arith.mulf %0, %3 : vector<1x64x128xf32>
    %c0_4 = arith.constant 0 : index
    %c0_5 = arith.constant 0 : index
    %c0_6 = arith.constant 0 : index
    %5 = vector.load %arg3[%c0_4, %c0_5, %c0_6] : memref<1x1x128xf32, #tpu.memory_space<vmem>>, vector<1x1x128xf32>
    %6 = vector.broadcast %5 : vector<1x1x128xf32> to vector<1x64x128xf32>
    %7 = arith.addf %4, %6 : vector<1x64x128xf32>
    %c0_7 = arith.constant 0 : index
    %c0_8 = arith.constant 0 : index
    %c0_9 = arith.constant 0 : index
    %8 = vector.load %arg5[%c0_7, %c0_8, %c0_9] : memref<1x64x128xf32, #tpu.memory_space<vmem>>, vector<1x64x128xf32>
    tpu.vector_store %arg5[%c0_7, %c0_8, %c0_9], %7 {strides = array<i32>} : memref<1x64x128xf32, #tpu.memory_space<vmem>>, vector<1x64x128xf32>,
    return
  }
  func.func @transform_0(%arg0: i32, %arg1: i32) -> (i32, i32, i32) {
    %c0_i32 = arith.constant 0 : i32
    %c0_i32_0 = arith.constant 0 : i32
    return %arg0, %arg1, %c0_i32 : i32, i32, i32
  }
  func.func @transform_1(%arg0: i32, %arg1: i32) -> (i32, i32, i32) {
    %c0_i32 = arith.constant 0 : i32
    %c0_i32_0 = arith.constant 0 : i32
    %c0_i32_1 = arith.constant 0 : i32
    return %arg0, %c0_i32, %c0_i32_0 : i32, i32, i32
  }
  func.func @transform_2(%arg0: i32, %arg1: i32) -> (i32, i32) {
    %c0_i32 = arith.constant 0 : i32
    %c0_i32_0 = arith.constant 0 : i32
    %c0_i32_1 = arith.constant 0 : i32
    return %c0_i32, %c0_i32_0 : i32, i32
  }
  func.func @transform_3(%arg0: i32, %arg1: i32) -> (i32, i32, i32) {
    %c0_i32 = arith.constant 0 : i32
    %c0_i32_0 = arith.constant 0 : i32
    return %arg0, %arg1, %c0_i32 : i32, i32, i32
  }
}

</mosaic_0001>

<bundles_post_ra>
// kernel: tpu_custom_call.1
= control target key start
LH: loop header
LB: loop body
LE: loop exit
PB: predicated region body
PF: predicated region fallthrough
CT: control target
= control target key end

     0   :  { %8 = vsyncpa [#allocation3], 0  ;;  %s800_s0 = inlined_call_operand.hbm [shape: f32[2,64,128], index: 0, kind: input, shape index: {}]   ;;  %s801_s1 = inlined_call_operand.vmem [shape: f32[2,1,128], index: 1, kind: input, shape index: {}]   ;;  %s802_s2 = inlined_call_operand.vmem [shape: f32[1,128], index: 2, kind: input, shape index: {}]   ;;  %s803_s3 = inlined_call_operand.hbm [shape: f32[2,64,128], index: 3, kind: output, shape index: {}]  }
   0x1   :  { %10 = vsyncpa [#allocation3 + $0x1], 0 }
   0x2   :  { %11 = vsyncpa [#allocation4], 0 }
   0x3   :  { %13 = vsyncpa [#allocation4 + $0x1], 0  ;;  %s606_s12 = smov 0   ;;  %s608_s13 = smov 0  }
   0x4   :  { %s610_s14 = smov 0   ;;  %s612_s15 = smov 0  }
   0x5   :  { %s614_s16 = smov 0   ;;  %s616_s17 = smov 0  }
   0x6 LB: > { %s381_s18 = sadd.s32 4294967295, %s578_s17   ;;  %s382_s19 = sadd.s32 4294967294, %s578_s17   ;;  %s578_s17 = sphi %s616_s17, %s19_s17   ;;  %s574_s16 = sphi %s614_s16, %s818_s16   ;;  %s570_s15 = sphi %s612_s15, %s817_s15   ;;  %s566_s14 = sphi %s610_s14, %s816_s14   ;;  %s562_s13 = sphi %s608_s13, %s815_s13   ;;  %s558_s12 = sphi %s606_s12, %s814_s12  }
   0x7   : > { %s31_s20 = sadd.s32 1, %s574_s16  ;;  %s40_s21 = sadd.s32 1, %s566_s14 }
   0x8   : > { %p33_p0 = scmp.ge.s32.totalorder %s31_s20, 2  ;;  %p47_p1 = scmp.ne.s32.totalorder %s566_s14, %s562_s13 }
   0x9   : > { %p48_p2 = scmp.eq.s32.totalorder %s578_s17, 0  ;;  %p53_p3 = scmp.ne.s32.totalorder %s562_s13, %s558_s12 }
   0xa   : > { %s820_s20 = smov (%p33_p0, %s31_s20), 0  ;;  %p54_p5 = scmp.eq.s32.totalorder %s381_s18, 0 }
   0xb   : > { %p647_p4 = por %p48_p2, %p47_p1  ;;  %s35_s23 = ssub.s32 %s574_s16, %s820_s20 }
   0xc   : > { %p126_p6 = scmp.eq.s32.totalorder %s381_s18, 1  ;;  %p38_p7 = scmp.eq.s32.totalorder %s35_s23, 0 }
   0xd   : > { %p653_p8 = por %p54_p5, %p53_p3  ;;  %p132_p10 = scmp.eq.s32.totalorder %s382_s19, 1 }
   0xe   : > { %p657_p9 = por %p126_p6, %p47_p1  ;;  %p412_p13 = scmp.lt.s32.totalorder %s578_s17, 2 }
   0xf   : > { %s662_s26 = scalar_select %p38_p7, %s566_s14, %s40_s21  }
  0x10   : > { %s807_s25 = scalar_select %p657_p9, 1, 0 }
  0x11   : > { %p664_p11 = por %p132_p10, %p53_p3  ;;  %s155_s28 = sand.u32 1, %s566_s14  }
  0x12   : > { %s385_s29 = sshll.u32 %s155_s28, 6  ;;  %s398_s30 = sshll.u32 %s574_s16, 10 }
  0x13   : > { %s808_s27 = scalar_select %p664_p11, 1, 0 }
  0x14   : > { %s675_s6 = scalar_lea.hbm %s800_s0, %s398_s30  ;;  %s159_s7 = scalar_lea.vmem [#allocation2], %s385_s29 }
  0x15   : > { %s168_s8 = sshll.u32 %s159_s7, 4  ;;  %p681_p0 = pnand %p412_p13, %p647_p4  ;;  %s677_s8 = int_to_ptr.vmem [resolvable:$true] %s168_s8 }
  0x16   : > { %s686_s10 = scalar_lea.sflag [#allocation3], %s155_s28  ;;  %s466_s11 = scalar_lea.hbm %s675_s6, 1024 }
  0x17   : > { %p467_p2 = scmp.ne.s32.totalorder %s675_s6, %s466_s11  ;;  %p468_p3 = pneg %p681_p0 }
  0x18   : > { %s471_s21 = scalar_lea.hbm %s800_s0, 2048  ;;  %p472_p4 = scmp.lt.u32.totalorder %s675_s6, %s800_s0 }
  0x19   : > { %p469_p5 = pnand %p468_p3, %p467_p2  ;;  %p473_p7 = scmp.lt.u32.totalorder %s471_s21, %s466_s11 }
  0x1a   : > { %p475_p13 = scmp.lt.u32.totalorder %s466_s11, %s675_s6 }
  0x1b   : > { %p470_p6 = pneg %p469_p5  ;;  %p474_p10 = por %p473_p7, %p472_p4 }
  0x1d   : > { %p476_p12 = por %p475_p13, %p474_p10 }
  0x1f   : > { %p477_p1 = pnand %p476_p12, %p470_p6 }
  0x21   : > { %480 = shalt.err (!%p477_p1)
}
  0x22   : > { %s481_s28 = scalar_lea.vmem %s677_s8, 1024  ;;  %s580_s29 = smov [#allocation2]  }
  0x23   : > { %p482_p2 = scmp.ne.s32.totalorder %s677_s8, %s481_s28  ;;  %s486_s30 = sshll.u32 %s580_s29, 4  ;;  %s487_s30 = int_to_ptr.vmem [resolvable:$false] %s486_s30 }
  0x24   : > { %s488_s4 = scalar_lea.vmem %s487_s30, 2048  ;;  %p489_p9 = scmp.lt.s32.totalorder %s677_s8, %s487_s30 }
  0x25   : > { %p484_p5 = pnand %p482_p2, %p468_p3  ;;  %p490_p4 = scmp.lt.s32.totalorder %s488_s4, %s481_s28 }
  0x27   : > { %p485_p11 = pneg %p484_p5  ;;  %p491_p7 = por %p490_p4, %p489_p9 }
  0x29   : > { %p492_p10 = pnand %p491_p7, %p485_p11 }
  0x2b   : > { %495 = shalt.err (!%p492_p10)
}
  0x2c   : > { %s581_s5 = smov 128   ;;  %s582_s7 = smov 8  }
  0x2d   : > { %407 = dma.hbm_to_vmem [thread:$0]  (!%p681_p0), %s675_s6, 1024, %s677_s8, %s686_s10, %s581_s5, %s581_s5, %s582_s7  }
  0x2e   : > { %p182_p12 = scmp.lt.s32.totalorder %s578_s17, 3  ;;  %p810_p1 = scmp.ge.s32.totalorder %s578_s17, 1 }
  0x30   : > { %p183_p3 = pnand %p810_p1, %p182_p12 }
  0x31   : > { %s718_s11 = sand.u32 (!%p183_p3), 1, %s562_s13  }
  0x32   : > { %186 = sbr.rel (%p183_p3) target bundleno = 87 (0x57), region = 32  ;;  %s389_s18 = sshll.u32 (!%p183_p3), %s718_s11, 6 }
  0x33   : > { %s189_s19 = scalar_lea.sflag (!%p183_p3), [#allocation3], %s718_s11  ;;  %s192_s21 = scalar_lea.vmem (!%p183_p3), [#allocation2], %s389_s18 }
  0x39   : > { %549 = dma.done.wait (%p653_p8), %s189_s19, 1024  }
  0x3a   : > { %551 = vsyncadd (%p653_p8), %s189_s19, 4294966272  ;;  %p219_p9 = scmp.lt.s32.totalorder %s570_s15, 1  ;;  %v223_v0 = vld [vmem:[%s192_s21] sm:$0xff]  ;;  %v224_v4 = vld [vmem:[%s192_s21 + $0x8] sm:$0xff]  ;;  %s734_s24 = scalar_lea.vmem [#allocation5], %s389_s18 }
  0x3b   : > { %v391_v1 = vld [vmem:[%s802_s2] ss:$0 sm:$0xff]  ;;  %v225_v5 = vld [vmem:[%s192_s21 + $0x10] sm:$0xff]  ;;  %v226_v6 = vld [vmem:[%s192_s21 + $0x18] sm:$0xff]  ;;  %s285_s28 = sshll.u32 %s734_s24, 4  ;;  %s399_s29 = sshll.u32 %s570_s15, 10  ;;  %s739_s28 = int_to_ptr.vmem [resolvable:$true] %s285_s28 }
  0x3c   : > { %s220_s6 = scalar_select %p219_p9, %s570_s15, 1  ;;  %v238_v3 = vmul.f32 %v391_v1, %v223_v0  ;;  %v239_v7 = vmul.f32 %v391_v1, %v224_v4  ;;  %v240_v8 = vmul.f32 %v391_v1, %v225_v5  ;;  %v241_v9 = vmul.f32 %v391_v1, %v226_v6  ;;  %v227_v10 = vld [vmem:[%s192_s21 + $0x20] sm:$0xff]  ;;  %v228_v11 = vld [vmem:[%s192_s21 + $0x28] sm:$0xff]  ;;  %v229_v12 = vld [vmem:[%s192_s21 + $0x30] sm:$0xff] }
  0x3d   : > { %v242_v14 = vmul.f32 %v391_v1, %v227_v10  ;;  %v243_v15 = vmul.f32 %v391_v1, %v228_v11  ;;  %v244_v16 = vmul.f32 %v391_v1, %v229_v12  ;;  %v230_v17 = vld [vmem:[%s192_s21 + $0x38] sm:$0xff]  ;;  %s744_s4 = scalar_lea.hbm %s803_s3, %s399_s29  ;;  %s270_s5 = scalar_lea.sflag [#allocation4], %s718_s11 }
  0x3e   : > { %s221_s10 = scalar_lea.vmem %s801_s1, %s220_s6  ;;  %v245_v21 = vmul.f32 %v391_v1, %v230_v17  ;;  %s496_s7 = scalar_lea.vmem %s739_s28, 1024 }
  0x3f   : > { %v392_v2 = vld [vmem:[%s221_s10] ss:$0 sm:$0xff]  ;;  %p497_p8 = scmp.ne.s32.totalorder %s739_s28, %s496_s7  ;;  %p811_p11 = scmp.ne.s32.totalorder %s807_s25, 0 }
  0x40   : > { %v253_v13 = vadd.f32 %v392_v2, %v238_v3  ;;  %v254_v18 = vadd.f32 %v392_v2, %v239_v7  ;;  %v255_v19 = vadd.f32 %v392_v2, %v240_v8  ;;  %v256_v20 = vadd.f32 %v392_v2, %v241_v9  ;;  %s583_s18 = smov [#allocation5]  }
  0x41   : > { %v257_v22 = vadd.f32 %v392_v2, %v242_v14  ;;  %v258_v23 = vadd.f32 %v392_v2, %v243_v15  ;;  %v259_v24 = vadd.f32 %v392_v2, %v244_v16  ;;  %v260_v25 = vadd.f32 %v392_v2, %v245_v21  ;;  %p498_p0 = pnand %p497_p8, %p811_p11  ;;  %s500_s19 = sshll.u32 %s583_s18, 4  ;;  %s501_s19 = int_to_ptr.vmem [resolvable:$false] %s500_s19 }
  0x42   : > { %261 = vst [vmem:[%s734_s24] sm:$0xff] %v253_v13  ;;  %262 = vst [vmem:[%s734_s24 + $0x8] sm:$0xff] %v254_v18  ;;  %s502_s21 = scalar_lea.vmem %s501_s19, 2048  ;;  %p503_p13 = scmp.lt.s32.totalorder %s739_s28, %s501_s19 }
  0x43   : > { %263 = vst [vmem:[%s734_s24 + $0x10] sm:$0xff] %v255_v19  ;;  %264 = vst [vmem:[%s734_s24 + $0x18] sm:$0xff] %v256_v20  ;;  %p499_p6 = pneg %p498_p0  ;;  %p504_p2 = scmp.lt.s32.totalorder %s502_s21, %s496_s7 }
  0x44   : > { %265 = vst [vmem:[%s734_s24 + $0x20] sm:$0xff] %v257_v22  ;;  %266 = vst [vmem:[%s734_s24 + $0x28] sm:$0xff] %v258_v23 }
  0x45   : > { %267 = vst [vmem:[%s734_s24 + $0x30] sm:$0xff] %v259_v24  ;;  %268 = vst [vmem:[%s734_s24 + $0x38] sm:$0xff] %v260_v25  ;;  %p505_p5 = por %p504_p2, %p503_p13 }
  0x47   : > { %p506_p4 = pnand %p505_p5, %p499_p6 }
  0x49   : > { %509 = shalt.err (!%p506_p4)
}
  0x4a   : > { %s510_s6 = scalar_lea.hbm %s744_s4, 1024  ;;  %s514_s10 = scalar_lea.hbm %s803_s3, 2048 }
  0x4b   : > { %p511_p7 = scmp.ne.s32.totalorder %s744_s4, %s510_s6  ;;  %p515_p1 = scmp.lt.u32.totalorder %s744_s4, %s803_s3 }
  0x4c   : > { %p516_p3 = scmp.lt.u32.totalorder %s514_s10, %s510_s6  ;;  %p518_p8 = scmp.lt.u32.totalorder %s510_s6, %s744_s4 }
  0x4d   : > { %p512_p10 = pnand %p511_p7, %p811_p11 }
  0x4e   : > { %p517_p9 = por %p516_p3, %p515_p1 }
  0x4f   : > { %p513_p12 = pneg %p512_p10 }
  0x50   : > { %p519_p0 = por %p518_p8, %p517_p9 }
  0x52   : > { %p520_p6 = pnand %p519_p0, %p513_p12 }
  0x54   : > { %523 = shalt.err (!%p520_p6)
}
  0x55   : > { %s584_s24 = smov 128   ;;  %s585_s29 = smov 8  }
  0x56   : > { %402 = dma.vmem_to_hbm [thread:$0]  (%p811_p11), %s739_s28, 1024, %s744_s4, %s270_s5, %s584_s24, %s584_s24, %s585_s29  }
  0x57 PF: > { %s300_s15 = sand.u32 1, %s558_s12   ;;  %p812_p13 = scmp.ne.s32.totalorder %s808_s27, 0 }
  0x58   : > { %p813_p2 = scmp.ge.s32.totalorder %s578_s17, 2  ;;  %s301_s30 = scalar_lea.sflag [#allocation4], %s300_s15 }
  0x5a   : > { %p409_p5 = pnand %p813_p2, %p812_p13 }
  0x5c   : > { %553 = dma.done.wait (!%p409_p5), %s301_s30, 1024  }
  0x5d   : > { %555 = vsyncadd (!%p409_p5), %s301_s30, 4294966272  ;;  %s19_s17 = sadd.s32 1, %s578_s17   ;;  %s814_s12 = smov %s562_s13 }
  0x5e   : > { %p16_p4 = scmp.ge.s32.totalorder %s19_s17, 4   ;;  %s815_s13 = smov %s566_s14 }
  0x5f   : > { %s816_s14 = smov %s662_s26  ;;  %s817_s15 = smov %s574_s16 }
  0x60   : > { %s818_s16 = smov %s820_s20  ;;  %18 = sbr.rel (!%p16_p4) target bundleno = 6 (0x6), region = 80 }
  0x67   :  { %306 = vsyncpa [#allocation3], 1 }
  0x68   :  { %308 = vsyncpa [#allocation3 + $0x1], 1 }
  0x69   :  { %309 = vsyncpa [#allocation4], 1 }
  0x6a   :  { %311 = vsyncpa [#allocation4 + $0x1], 1 }

</bundles_post_ra>
